<compile_context>
chip_gen: v7x
topology: tpu7x:2x2x1
jax: 0.10.0
libtpu: 0.0.40
codegen_flags: <defaults>
</compile_context>

<pallas_src>
import math

import jax
import jax.numpy as jnp
from jax import lax
from jax.experimental import pallas as pl
from jax.experimental.pallas import tpu as pltpu


def _round_up(x, m):
    return (x + m - 1) // m * m


def _cdiv(a, b):
    return (a + b - 1) // b


def _vmem_capacity_bytes():
    """Physical per-core VMEM; fall back to the v7x (smallest-gen) value."""
    try:
        info = pltpu.get_tpu_info()
        cap = getattr(info, "vmem_capacity_bytes", None)
        if cap:
            return int(cap)
    except Exception:
        pass
    return 64 * 1024 * 1024


def _choose_batch_tile(B, d_in, x_itemsize, vmem_cap):
    """Pick the batch tile from the VMEM budget (not a fixed row count)."""
    # Each of the 2 pipelined x buffers gets <= 1/4 of VMEM, capped at 16 MiB
    # (4-16 MiB tiles already sit near the HBM roofline; bigger only eats headroom).
    per_buffer = min(16 * 1024 * 1024, vmem_cap // 4)
    row_bytes = _round_up(d_in, 128) * x_itemsize   # conservative lane-padded VMEM row
    tb = max(8, per_buffer // row_bytes)
    if tb >= 512:
        tb = (tb // 512) * 512
    else:
        # Very wide d_in: keep the tile at ~budget size with tb a sublane multiple.
        # (For extreme d_in, tile d_in as a trailing "arbitrary" axis instead.)
        tb = max(8, (tb // 8) * 8)
    if B <= tb:
        if B >= 1024:
            # Guarantee >= 2 grid steps so both v7x TensorCores stream from HBM.
            tb = _round_up(_cdiv(B, 2), 512)
        else:
            tb = B   # tiny batch: single full-extent tile (block == full array dims)
    return tb


def _logistic_kernel_bt(x_ref, w_ref, b_ref, o_ref):
    # x: (tb, d_in)  w: (d_out, d_in)  b: (d_out, 1)  o: (d_out, tb)   [small d_out]
    # z = W @ x^T, contracting d_in of both operands (A @ B^T form); f32 accumulate.
    z = lax.dot_general(
        w_ref[...], x_ref[...],
        dimension_numbers=(((1,), (1,)), ((), ())),
        preferred_element_type=jnp.float32,
    )
    # Lane-dense epilogue: bias broadcast add + sigmoid on full (d_out, tb) vregs.
    o_ref[...] = jax.nn.sigmoid(z + b_ref[...]).astype(o_ref.dtype)


def _logistic_kernel_bn(x_ref, w_ref, b_ref, o_ref):
    # x: (tb, d_in)  w: (d_out, d_in)  b: (1, d_out)  o: (tb, d_out)   [d_out >= 128]
    z = lax.dot_general(
        x_ref[...], w_ref[...],
        dimension_numbers=(((1,), (1,)), ((), ())),
        preferred_element_type=jnp.float32,
    )
    o_ref[...] = jax.nn.sigmoid(z + b_ref[...]).astype(o_ref.dtype)


def simple_classifier(x, weight, bias, *, compute_dtype=jnp.bfloat16):
    """sigmoid(x @ weight.T + bias) — matches PyTorch SimpleClassifier.forward.

    x:      (B, d_in)     float32 (cast to `compute_dtype` for the HBM/MXU path)
    weight: (d_out, d_in) float32, native nn.Linear layout (never pre-transposed)
    bias:   (d_out,)      float32
    returns (B, d_out)    float32
    """
    B, d_in = x.shape
    d_out, d_in_w = weight.shape
    assert d_in_w == d_in and bias.shape == (d_out,)

    # In a real pipeline x/W would already arrive in bf16; casting here halves the
    # kernel's HBM traffic while accumulation & epilogue stay f32.
    x_c = x.astype(compute_dtype)
    w_c = weight.astype(compute_dtype)
    b_f32 = bias.astype(jnp.float32)
    x_itemsize = x_c.dtype.itemsize

    vmem_cap = _vmem_capacity_bytes()
    tb = _choose_batch_tile(B, d_in, x_itemsize, vmem_cap)
    grid = (_cdiv(B, tb),)

    transposed_out = d_out < 128

    # Conservative (lane/sublane padded) VMEM footprint for the scoped-VMEM limit.
    x_buf = tb * _round_up(d_in, 128) * x_itemsize
    if transposed_out:
        out_buf = _round_up(d_out, 8) * _round_up(tb, 128) * 4
    else:
        out_buf = _round_up(tb, 8) * _round_up(d_out, 128) * 4
    w_buf = _round_up(d_out, 16) * _round_up(d_in, 128) * x_itemsize
    vmem_limit = int(min(vmem_cap * 3 // 4,
                         max(2 * x_buf + 2 * out_buf + 2 * w_buf + (8 << 20),
                             32 << 20)))

    cparams = pltpu.CompilerParams(
        dimension_semantics=("parallel",),   # megacore-shard the batch grid
        vmem_limit_bytes=vmem_limit,
    )

    if transposed_out:
        bias_blk = b_f32.reshape(d_out, 1)
        out_t = pl.pallas_call(
            _logistic_kernel_bt,
            out_shape=jax.ShapeDtypeStruct((d_out, B), jnp.float32),
            grid=grid,
            in_specs=[
                pl.BlockSpec((tb, d_in), lambda i: (i, 0)),       # x: tiled over batch
                pl.BlockSpec((d_out, d_in), lambda i: (0, 0)),    # W: resident, native layout
                pl.BlockSpec((d_out, 1), lambda i: (0, 0)),       # bias: resident f32
            ],
            out_specs=pl.BlockSpec((d_out, tb), lambda i: (0, i)),  # lane-dense in batch
            compiler_params=cparams,
        )(x_c, w_c, bias_blk)
        # Back to PyTorch layout (B, d_out); for d_out == 1 this is just a reshape.
        return out_t.T
    else:
        bias_blk = b_f32.reshape(1, d_out)
        return pl.pallas_call(
            _logistic_kernel_bn,
            out_shape=jax.ShapeDtypeStruct((B, d_out), jnp.float32),
            grid=grid,
            in_specs=[
                pl.BlockSpec((tb, d_in), lambda i: (i, 0)),
                pl.BlockSpec((d_out, d_in), lambda i: (0, 0)),
                pl.BlockSpec((1, d_out), lambda i: (0, 0)),
            ],
            out_specs=pl.BlockSpec((tb, d_out), lambda i: (i, 0)),
            compiler_params=cparams,
        )(x_c, w_c, bias_blk)


def init_params(key, input_dim, output_dim=1):
    # Mirror nn.Linear default init: U(-1/sqrt(in), 1/sqrt(in)), deterministic.
    kw, kb = jax.random.split(key)
    bound = 1.0 / math.sqrt(input_dim)
    weight = jax.random.uniform(kw, (output_dim, input_dim),
                                minval=-bound, maxval=bound, dtype=jnp.float32)
    bias = jax.random.uniform(kb, (output_dim,),
                              minval=-bound, maxval=bound, dtype=jnp.float32)
    return weight, bias


if __name__ == "__main__":
    key = jax.random.PRNGKey(0)
    kx, kp = jax.random.split(key)

    batch, input_dim, output_dim = 8, 32, 1
    x = jax.random.normal(kx, (batch, input_dim), dtype=jnp.float32)
    weight, bias = init_params(kp, input_dim, output_dim)

    out = jax.block_until_ready(simple_classifier(x, weight, bias))

    # Cross-check against pure-JAX f32 reference (bf16 inputs + f32 accumulation
    # => ~1e-2-relative agreement).
    ref = jax.nn.sigmoid(x @ weight.T + bias)
    assert out.shape == (batch, output_dim)
    assert jnp.allclose(out, ref, atol=2e-2, rtol=2e-2)

    print("KERNEL_OK")
</pallas_src>

<mosaic_0001>
module attributes {stable_mosaic.version = 11 : i64} {
  func.func @_logistic_kernel_bt(%arg0: i32, %arg1: memref<8x32xbf16, #tpu.memory_space<vmem>>, %arg2: memref<1x32xbf16, #tpu.memory_space<vmem>>, %arg3: memref<1x1xf32, #tpu.memory_space<vmem>>, %arg4: memref<1x8xf32, #tpu.memory_space<vmem>>) attributes {dimension_semantics = [#tpu.dimension_semantics<parallel>], iteration_bounds = array<i64: 1>, scalar_prefetch = 0 : i64, scratch_operands = 0 : i64, tpu.core_type = #tpu.core_type<tc>, window_params = [{transform_indices = @transform_0, window_bounds = array<i64: 8, 32>}, {pipeline_mode = #tpu.pipeline_mode<synchronous>, transform_indices = @transform_1, window_bounds = array<i64: 1, 32>}, {pipeline_mode = #tpu.pipeline_mode<synchronous>, transform_indices = @transform_2, window_bounds = array<i64: 1, 1>}, {transform_indices = @transform_3, window_bounds = array<i64: 1, 8>}]} {
    %c0 = arith.constant 0 : index
    %c0_0 = arith.constant 0 : index
    %0 = vector.load %arg2[%c0, %c0_0] : memref<1x32xbf16, #tpu.memory_space<vmem>>, vector<1x32xbf16>
    %c0_1 = arith.constant 0 : index
    %c0_2 = arith.constant 0 : index
    %1 = vector.load %arg1[%c0_1, %c0_2] : memref<8x32xbf16, #tpu.memory_space<vmem>>, vector<8x32xbf16>
    %cst = arith.constant dense<0.000000e+00> : vector<1x8xf32>
    %2 = tpu.matmul %0, %1, %cst {dimension_numbers = #tpu.dot_dimension_numbers<[1], [1], [0], [0], [0, 0, 1, 0], [], []>} : vector<1x32xbf16>, vector<8x32xbf16>, vector<1x8xf32> -> vector<1x8xf32>
    %c0_3 = arith.constant 0 : index
    %c0_4 = arith.constant 0 : index
    %3 = vector.load %arg3[%c0_3, %c0_4] : memref<1x1xf32, #tpu.memory_space<vmem>>, vector<1x1xf32>
    %4 = vector.broadcast %3 : vector<1x1xf32> to vector<1x8xf32>
    %5 = arith.addf %2, %4 : vector<1x8xf32>
    %6 = arith.negf %5 : vector<1x8xf32>
    %7 = math.exp %6 : vector<1x8xf32>
    %cst_5 = arith.constant 1.000000e+00 : f32
    %8 = vector.broadcast %cst_5 : f32 to vector<1x8xf32>
    %9 = arith.addf %8, %7 : vector<1x8xf32>
    %10 = arith.divf %8, %9 : vector<1x8xf32>
    %c0_6 = arith.constant 0 : index
    %c0_7 = arith.constant 0 : index
    %11 = vector.load %arg4[%c0_6, %c0_7] : memref<1x8xf32, #tpu.memory_space<vmem>>, vector<1x8xf32>
    tpu.vector_store %arg4[%c0_6, %c0_7], %10 {strides = array<i32>} : memref<1x8xf32, #tpu.memory_space<vmem>>, vector<1x8xf32>,
    return
  }
  func.func @transform_0(%arg0: i32) -> (i32, i32) {
    %c0_i32 = arith.constant 0 : i32
    %c0_i32_0 = arith.constant 0 : i32
    return %arg0, %c0_i32 : i32, i32
  }
  func.func @transform_1(%arg0: i32) -> (i32, i32) {
    %c0_i32 = arith.constant 0 : i32
    %c0_i32_0 = arith.constant 0 : i32
    %c0_i32_1 = arith.constant 0 : i32
    return %c0_i32, %c0_i32_0 : i32, i32
  }
  func.func @transform_2(%arg0: i32) -> (i32, i32) {
    %c0_i32 = arith.constant 0 : i32
    %c0_i32_0 = arith.constant 0 : i32
    %c0_i32_1 = arith.constant 0 : i32
    return %c0_i32, %c0_i32_0 : i32, i32
  }
  func.func @transform_3(%arg0: i32) -> (i32, i32) {
    %c0_i32 = arith.constant 0 : i32
    %c0_i32_0 = arith.constant 0 : i32
    return %c0_i32, %arg0 : i32, i32
  }
}

</mosaic_0001>

<bundles_post_ra>
// kernel: tpu_custom_call.1
= control target key start
LH: loop header
LB: loop body
LE: loop exit
PB: predicated region body
PF: predicated region fallthrough
CT: control target
= control target key end

     0   :  { %s235_s0 = inlined_call_operand.hbm [shape: bf16[8,32], index: 0, kind: input, shape index: {}]   ;;  %s236_s1 = inlined_call_operand.vmem [shape: bf16[1,32], index: 1, kind: input, shape index: {}]   ;;  %s237_s2 = inlined_call_operand.<no memory space> [shape: f32[1,1], index: 2, kind: input, shape index: {}]   ;;  %s238_s3 = inlined_call_operand.hbm [shape: f32[1,8], index: 3, kind: output, shape index: {}]  }
   0x1   :  { %v8_v0 = vstv %s237_s2 }
   0x2   :  { %9 = vst [vmem:[#allocation2] sm:$0x1] %v8_v0 }
   0x3   :  { %10 = vsyncpa [#allocation4], 0 }
   0x4   :  { %11 = vsyncpa [#allocation5], 0  ;;  %s180_s14 = smov [#allocation3]   ;;  %s132_s18 = scalar_lea.hbm %s235_s0, 64 }
   0x5   :  { %s18_s15 = sshll.u32 %s180_s14, 4  ;;  %p133_p0 = scmp.ne.s32.totalorder %s235_s0, %s132_s18  ;;  %s19_s15 = int_to_ptr.vmem [resolvable:$true] %s18_s15 }
   0x6   :  { %p136_p1 = scmp.lt.u32.totalorder %s132_s18, %s235_s0 }
   0x8   :  { %p138_p2 = pnand %p136_p1, %p133_p0 }
   0xa   :  { %141 = shalt.err (!%p138_p2)
}
   0xb   :  { %s142_s2 = scalar_lea.vmem %s19_s15, 64  ;;  %p147_p4 = scmp.lt.s32.totalorder %s19_s15, %s19_s15 }
   0xc   :  { %p143_p3 = scmp.ne.s32.totalorder %s19_s15, %s142_s2  ;;  %p148_p5 = scmp.lt.s32.totalorder %s142_s2, %s142_s2 }
   0xe   :  { %p149_p6 = por %p148_p5, %p147_p4 }
  0x10   :  { %p150_p7 = pnand %p149_p6, %p143_p3 }
  0x12   :  { %153 = shalt.err (!%p150_p7)
}
  0x13   :  { %21 = dma.hbm_to_vmem [thread:$0]  %s235_s0, 64, %s19_s15, [#allocation4]  }
  0x14   :  { %176 = dma.done.wait [#allocation4], 64  }
  0x15   :  { %177 = vsyncadd [#allocation4], 4294967232  ;;  %v181_v1 = vmov 0.0   ;;  %vm182_vm0 = vmmov 0   ;;  %v183_v2 = vmov 0   ;;  %vm42_vm1 = vcmask 261120  }
  0x16   :  { %116 = vmatprep.subr.bf16.mxu0 %v181_v1  ;;  %118 = vmatprep.mubr.msk.bf16.mxu0 %vm182_vm0, %v181_v1  ;;  %v31_v3 = vld [vmem:[#allocation3] sm:$0xf]  ;;  %v32_v4 = vld [vmem:[#allocation2] sm:$0x1]  ;;  %v38_v7 = vlaneseq  ;;  %s184_s0 = smov [#allocation6]   ;;  %vm95_vm2 = vcmask 57344  }
  0x17   :  { %127 = vset.pattern.permute.xlu0 %v183_v2  ;;  %v47_v5 = vsel %vm42_vm1, %v31_v3, 0  ;;  %v30_v6 = vld [vmem:[%s236_s1] sm:$0x1]  ;;  %s103_s27 = sshll.u32 %s184_s0, 4  ;;  %s104_s27 = int_to_ptr.vmem [resolvable:$true] %s103_s27 }
  0x18   :  { %35 = vperm.xlu0 %127, %v32_v4   ;;  %117 = vmatpush3.bf16.xpose.msra.mxu0 %v47_v5  ;;  %v39_v8 = vshrl.u32 %v38_v7, 7  ;;  %s154_s1 = scalar_lea.vmem %s104_s27, 16  ;;  %s158_s28 = scalar_lea.vmem %s104_s27, 32 }
  0x19   :  { %p155_p8 = scmp.ne.s32.totalorder %s104_s27, %s154_s1  ;;  %p159_p9 = scmp.lt.s32.totalorder %s104_s27, %s104_s27 }
  0x1a   :  { %v40_v9 = vsub.s32 0, %v39_v8  ;;  %p160_p10 = scmp.lt.s32.totalorder %s158_s28, %s154_s1 }
  0x1c   :  { %p161_p11 = por %p160_p10, %p159_p9 }
  0x1e   :  { %p162_p12 = pnand %p161_p11, %p155_p8 }
  0x1f   :  { %119 = vmatmul.mubr.msk.bf16.vlgmr.msra.gmra.mrb[0].mxu0 %vm42_vm1, %v30_v6 }
  0x97   :  { %v36_v10 = vpop.permute.xlu0 %35 }
  0x98   :  { %v41_v11 = vrot.slane %v36_v10, %v40_v9 }
  0xf2   :  { %v83_v12 = vpop.f32.mrb[0].mxu0 }
  0xf3   :  { %v84_v13 = vadd.f32 %v83_v12, %v41_v11  ;;  %v120_v14 = vpop.f32.mrb[1].mxu0 }
  0xf4   :  { %v86_v15 = vpop.f32.mrb[2].mxu0 }
  0xf5   :  { %v113_v16 = vmul.f32 -1.442695, %v84_v13  ;;  %v121_v17 = vpop.f32.mrb[3].mxu0 }
  0xf7   :  { %128 = vpow2.f32 %v113_v16 }
 0x101   :  { %v129_v18 = vpop.eup %128 }
 0x102   :  { %v92_v19 = vadd.f32 1.0, %v129_v18 }
 0x104   :  { %130 = vrcp.f32 %v92_v19 }
 0x10e   :  { %v131_v20 = vpop.eup %130 }
 0x10f   :  { %96 = vst.msk [vmem:[#allocation6] sm:$0x1] %vm95_vm2, %v131_v20 }
 0x110   :  { %165 = shalt.err (!%p162_p12)
}
 0x111   :  { %s166_s4 = scalar_lea.hbm %s238_s3, 16 }
 0x112   :  { %p167_p13 = scmp.ne.s32.totalorder %s238_s3, %s166_s4  ;;  %p170_p0 = scmp.lt.u32.totalorder %s166_s4, %s238_s3 }
 0x114   :  { %p172_p1 = pnand %p170_p0, %p167_p13 }
 0x116   :  { %175 = shalt.err (!%p172_p1)
}
 0x117   :  { %106 = dma.vmem_to_hbm [thread:$0]  %s104_s27, 16, %s238_s3, [#allocation5]  }
 0x118   :  { %178 = dma.done.wait [#allocation5], 16  }
 0x119   :  { %179 = vsyncadd [#allocation5], 4294967280 }
 0x11a   :  { %110 = vsyncpa [#allocation4], 1 }
 0x11b   :  { %111 = vsyncpa [#allocation5], 1 }

</bundles_post_ra>
